<compile_context>
chip_gen: v5e
topology: v5e:2x2
jax: 0.10.0
libtpu: 0.0.40
codegen_flags: <defaults>
</compile_context>

<pallas_src>
import functools
import math

import jax
import jax.numpy as jnp
import numpy as np
from jax.experimental import pallas as pl
from jax.experimental.pallas import tpu as pltpu


# ----------------------------------------------------------------------------
# Kernel 1: Gram-matrix statistics pass (accumulates Ga = Pa @ Pa^T over M).
# ----------------------------------------------------------------------------
def _gram_kernel(p_ref, g_ref):
    @pl.when(pl.program_id(0) == 0)
    def _init():
        g_ref[...] = jnp.zeros_like(g_ref)

    p = p_ref[...]                                   # (Fp, TM) bf16
    g_ref[...] += jax.lax.dot_general(
        p, p, dimension_numbers=(((1,), (1,)), ((), ())),
        preferred_element_type=jnp.float32)          # A @ A^T on the MXU


# ----------------------------------------------------------------------------
# Kernel 2: fused transposed-conv + (folded) ComplexBatchNorm + CLeakyReLU.
# ----------------------------------------------------------------------------
def _apply_kernel(w_ref, p_ref, o_ref, *, slope):
    # w: (2*Cout, Fp) bf16   p: (Fp, TM) bf16   o: (2*Cout, TM) f32
    y = jnp.dot(w_ref[...], p_ref[...], preferred_element_type=jnp.float32)
    o_ref[...] = jnp.where(y >= 0.0, y, slope * y)


# ----------------------------------------------------------------------------
# Plain-JAX glue: padded_cat, dilation/padding, transposed im2col, weights.
# ----------------------------------------------------------------------------
def pad2d_as(x1, x2):
    dH = x2.shape[2] - x1.shape[2]
    dW = x2.shape[3] - x1.shape[3]
    return jnp.pad(x1, ((0, 0), (0, 0), (0, dH), (0, dW)))


def padded_cat(x1, x2):
    return jnp.concatenate([pad2d_as(x1, x2), x2], axis=1)


def _round_up(x, m):
    return (x + m - 1) // m * m


def _dilate_and_pad(x, stride, padding, ksize):
    N, C, H, W = x.shape
    sh, sw = stride
    ph, pw = padding
    kh, kw = ksize
    Hd = (H - 1) * sh + 1
    Wd = (W - 1) * sw + 1
    xd = jnp.zeros((N, C, Hd, Wd), x.dtype).at[:, :, ::sh, ::sw].set(x)
    return jnp.pad(xd, ((0, 0), (0, 0),
                        (kh - 1 - ph, kh - 1 - ph),
                        (kw - 1 - pw, kw - 1 - pw)))


def _im2col_T(xd, kh, kw, Ho, Wo):
    # (N, C, Hp, Wp) -> (C*kh*kw, N*Ho*Wo); row order (ci, i, j), col (n, y, x)
    cols = [xd[:, :, i:i + Ho, j:j + Wo] for i in range(kh) for j in range(kw)]
    p = jnp.stack(cols, axis=2)               # (N, C, kh*kw, Ho, Wo)
    p = p.transpose(1, 2, 0, 3, 4)            # (C, kh*kw, N, Ho, Wo)
    C = p.shape[0]
    return p.reshape(C * kh * kw, -1)


def _weight_matrix(Wt):
    # ConvTranspose2d weight (Cin, Cout, kh, kw) -> (Cin*kh*kw, Cout), with the
    # spatial flip so it matches the im2col feature ordering (ci, i, j).
    Cin, Cout, kh, kw = Wt.shape
    Wf = Wt[:, :, ::-1, ::-1]
    return Wf.transpose(0, 2, 3, 1).reshape(Cin * kh * kw, Cout)


# ----------------------------------------------------------------------------
# Forward pass.
# ----------------------------------------------------------------------------
@functools.partial(jax.jit,
                   static_argnames=("stride", "padding", "eps", "leaky_slope", "tm"))
def dcu_net_decoder_forward(xr, xi, skip, Wre, Wim,
                            bn_wrr, bn_wri, bn_wii, bn_br, bn_bi,
                            *, stride, padding, eps=1e-5, leaky_slope=0.1, tm=512):
    assert tm % 128 == 0
    if skip is not None:
        xr = padded_cat(xr, skip[0])
        xi = padded_cat(xi, skip[1])

    N, Cin, H, W = xr.shape
    Cin_w, Cout, kh, kw = Wre.shape
    assert Cin == Cin_w
    sh, sw = stride
    ph, pw = padding
    assert kh - 1 - ph >= 0 and kw - 1 - pw >= 0
    Ho = (H - 1) * sh - 2 * ph + kh
    Wo = (W - 1) * sw - 2 * pw + kw
    M = N * Ho * Wo
    K = Cin * kh * kw

    # --- transposed, augmented patch matrix (features on sublanes, M on lanes)
    xrd = _dilate_and_pad(xr, stride, padding, (kh, kw))
    xid = _dilate_and_pad(xi, stride, padding, (kh, kw))
    ptr = _im2col_T(xrd, kh, kw, Ho, Wo)                 # (K, M)
    pti = _im2col_T(xid, kh, kw, Ho, Wo)                 # (K, M)

    F = 2 * K + 1                                        # + ones row (sums/count)
    Fp = _round_up(F, 16)                                # bf16 sublane friendly
    Mp = _round_up(M, tm)                                # lane / tile friendly
    pta = jnp.concatenate([ptr, pti, jnp.ones((1, M), ptr.dtype)], axis=0)
    pta = jnp.pad(pta, ((0, Fp - F), (0, Mp - M)))       # zero pad: exact stats
    pta_bf16 = pta.astype(jnp.bfloat16)

    ntiles = Mp // tm
    vmem_limit = 32 * 1024 * 1024                        # safe on v5e/v6e/v7x

    # --- Pass 1: accumulate Ga = Pa @ Pa^T over M tiles ----------------------
    ga = pl.pallas_call(
        _gram_kernel,
        out_shape=jax.ShapeDtypeStruct((Fp, Fp), jnp.float32),
        grid=(ntiles,),
        in_specs=[pl.BlockSpec((Fp, tm), lambda i: (0, i))],
        out_specs=pl.BlockSpec((Fp, Fp), lambda i: (0, 0)),
        compiler_params=pltpu.CompilerParams(
            dimension_semantics=("arbitrary",), vmem_limit_bytes=vmem_limit),
    )(pta_bf16)

    # --- per-channel ComplexBatchNorm statistics + folding (tiny, f32) -------
    Wre_m = _weight_matrix(Wre).astype(jnp.float32)      # (K, Cout)
    Wim_m = _weight_matrix(Wim).astype(jnp.float32)
    Wr_blk = jnp.concatenate([Wre_m, -Wim_m], axis=0)    # yr = P @ Wr_blk
    Wi_blk = jnp.concatenate([Wim_m, Wre_m], axis=0)     # yi = P @ Wi_blk

    G = ga[:2 * K, :2 * K]                               # P^T P
    sp = ga[2 * K, :2 * K]                               # column sums of P
    inv_m = 1.0 / float(M)

    Mr = (sp @ Wr_blk) * inv_m
    Mi = (sp @ Wi_blk) * inv_m
    GWr = G @ Wr_blk
    GWi = G @ Wi_blk
    Err = jnp.sum(Wr_blk * GWr, axis=0) * inv_m
    Eri = jnp.sum(Wr_blk * GWi, axis=0) * inv_m
    Eii = jnp.sum(Wi_blk * GWi, axis=0) * inv_m

    Vrr = Err - Mr * Mr + eps
    Vri = Eri - Mr * Mi
    Vii = Eii - Mi * Mi + eps
    tau = Vrr + Vii
    delta = Vrr * Vii - Vri * Vri
    s = jnp.sqrt(delta)
    t = jnp.sqrt(tau + 2.0 * s)
    rst = 1.0 / (s * t)
    Urr = (s + Vii) * rst
    Uii = (s + Vrr) * rst
    Uri = -Vri * rst

    wrr = bn_wrr.astype(jnp.float32)
    wri = bn_wri.astype(jnp.float32)
    wii = bn_wii.astype(jnp.float32)
    Zrr = wrr * Urr + wri * Uri
    Zri = wrr * Uri + wri * Uii
    Zir = wri * Urr + wii * Uri
    Zii = wri * Uri + wii * Uii
    cr = bn_br.astype(jnp.float32) - Zrr * Mr - Zri * Mi   # mean folded into bias
    ci = bn_bi.astype(jnp.float32) - Zir * Mr - Zii * Mi

    # Fold whitening + affine + bias into a single (2*Cout, Fp) weight.
    W_real = Zrr[:, None] * Wr_blk.T + Zri[:, None] * Wi_blk.T   # (Cout, 2K)
    W_imag = Zir[:, None] * Wr_blk.T + Zii[:, None] * Wi_blk.T   # (Cout, 2K)
    W_app = jnp.concatenate([W_real, W_imag], axis=0)            # (2Cout, 2K)
    bias = jnp.concatenate([cr, ci], axis=0)[:, None]            # (2Cout, 1)
    W_aug = jnp.concatenate([W_app, bias], axis=1)               # (2Cout, F)
    W_aug = jnp.pad(W_aug, ((0, 0), (0, Fp - F))).astype(jnp.bfloat16)

    # --- Pass 2: lane-dense output tiles, parallel over M ---------------------
    out_t = pl.pallas_call(
        functools.partial(_apply_kernel, slope=leaky_slope),
        out_shape=jax.ShapeDtypeStruct((2 * Cout, Mp), jnp.float32),
        grid=(ntiles,),
        in_specs=[pl.BlockSpec((2 * Cout, Fp), lambda i: (0, 0)),
                  pl.BlockSpec((Fp, tm), lambda i: (0, i))],
        out_specs=pl.BlockSpec((2 * Cout, tm), lambda i: (0, i)),
        compiler_params=pltpu.CompilerParams(
            dimension_semantics=("parallel",), vmem_limit_bytes=vmem_limit),
    )(W_aug, pta_bf16)

    out_t = out_t[:, :M]                                  # crop padded columns
    yr = out_t[:Cout].reshape(Cout, N, Ho, Wo).transpose(1, 0, 2, 3)
    yi = out_t[Cout:].reshape(Cout, N, Ho, Wo).transpose(1, 0, 2, 3)
    return yr, yi


# ----------------------------------------------------------------------------
# Pure-JAX f32 reference of the PyTorch module (independent of the kernels).
# ----------------------------------------------------------------------------
def _conv_transpose_ref(x, w, stride, padding):
    kh, kw = w.shape[2], w.shape[3]
    ph, pw = padding
    wf = jnp.flip(w, axis=(2, 3)).transpose(1, 0, 2, 3)   # (Cout, Cin, kh, kw)
    return jax.lax.conv_general_dilated(
        x, wf, window_strides=(1, 1),
        padding=((kh - 1 - ph, kh - 1 - ph), (kw - 1 - pw, kw - 1 - pw)),
        lhs_dilation=stride,
        dimension_numbers=("NCHW", "OIHW", "NCHW"),
        precision=jax.lax.Precision.HIGHEST)


def _reference_forward(xr, xi, skip, Wre, Wim, wrr, wri, wii, br, bi,
                       stride, padding, eps, slope):
    if skip is not None:
        xr = padded_cat(xr, skip[0])
        xi = padded_cat(xi, skip[1])
    yr = (_conv_transpose_ref(xr, Wre, stride, padding)
          - _conv_transpose_ref(xi, Wim, stride, padding))
    yi = (_conv_transpose_ref(xi, Wre, stride, padding)
          + _conv_transpose_ref(xr, Wim, stride, padding))
    axes = (0, 2, 3)
    C = yr.shape[1]
    vd = (1, C, 1, 1)
    Mr = yr.mean(axes, keepdims=True)
    Mi = yi.mean(axes, keepdims=True)
    xr_, xi_ = yr - Mr, yi - Mi
    Vrr = (xr_ * xr_).mean(axes, keepdims=True) + eps
    Vri = (xr_ * xi_).mean(axes, keepdims=True)
    Vii = (xi_ * xi_).mean(axes, keepdims=True) + eps
    tau = Vrr + Vii
    delta = Vrr * Vii - Vri * Vri
    s = jnp.sqrt(delta)
    t = jnp.sqrt(tau + 2 * s)
    rst = 1.0 / (s * t)
    Urr, Uii, Uri = (s + Vii) * rst, (s + Vrr) * rst, -Vri * rst
    Wrr, Wri, Wii = wrr.reshape(vd), wri.reshape(vd), wii.reshape(vd)
    Zrr = Wrr * Urr + Wri * Uri
    Zri = Wrr * Uri + Wri * Uii
    Zir = Wri * Urr + Wii * Uri
    Zii = Wri * Uri + Wii * Uii
    outr = Zrr * xr_ + Zri * xi_ + br.reshape(vd)
    outi = Zir * xr_ + Zii * xi_ + bi.reshape(vd)
    lrelu = lambda v: jnp.where(v >= 0, v, slope * v)
    return lrelu(outr), lrelu(outi)


# ----------------------------------------------------------------------------
# Deterministic parameter init (mirrors complex_rayleigh_init + BN reset).
# ----------------------------------------------------------------------------
def complex_rayleigh_init(key, shape, fanin, gain=1.0):
    scale = float(gain) / float(fanin)
    k1, k2 = jax.random.split(key)
    theta = jax.random.uniform(k1, shape, minval=-math.pi / 2, maxval=math.pi / 2)
    u = jax.random.uniform(k2, shape, minval=1e-7, maxval=1.0)
    rho = scale * jnp.sqrt(-2.0 * jnp.log(u))           # Rayleigh(scale)
    return (rho * jnp.cos(theta)).astype(jnp.float32), \
           (rho * jnp.sin(theta)).astype(jnp.float32)


if __name__ == "__main__":
    key = jax.random.PRNGKey(0)
    ks = jax.random.split(key, 8)

    # Decoder stage: x has 4 channels, encoder skip has 4 -> concat = 8 in ch.
    N, Cx, Cs, H, W = 2, 4, 4, 8, 8
    Cin, Cout = Cx + Cs, 4
    ksize, stride, padding = (3, 3), (2, 2), (1, 1)
    leaky_slope, eps = 0.1, 1e-5

    xr = jax.random.normal(ks[0], (N, Cx, H, W), jnp.float32)
    xi = jax.random.normal(ks[1], (N, Cx, H, W), jnp.float32)
    skip_r = jax.random.normal(ks[2], (N, Cs, H, W), jnp.float32)
    skip_i = jax.random.normal(ks[3], (N, Cs, H, W), jnp.float32)

    # ConvTranspose2d weights: (in_channels, out_channels, kh, kw), bias=False.
    fanin = Cin * ksize[0] * ksize[1]
    Wre, Wim = complex_rayleigh_init(ks[4], (Cin, Cout, *ksize), fanin)

    # ComplexBatchNorm parameters (reset_parameters()).
    bn_wrr = jnp.ones((Cout,), jnp.float32)
    bn_wii = jnp.ones((Cout,), jnp.float32)
    bn_wri = jax.random.uniform(ks[5], (Cout,), jnp.float32, minval=-0.9, maxval=0.9)
    bn_br = jnp.zeros((Cout,), jnp.float32)
    bn_bi = jnp.zeros((Cout,), jnp.float32)

    yr, yi = dcu_net_decoder_forward(
        xr, xi, (skip_r, skip_i), Wre, Wim,
        bn_wrr, bn_wri, bn_wii, bn_br, bn_bi,
        stride=stride, padding=padding, eps=eps, leaky_slope=leaky_slope,
        tm=256)                      # M=450 -> Mp=512 -> 2 grid tiles
    yr = jax.block_until_ready(yr)
    yi = jax.block_until_ready(yi)

    Ho = (H - 1) * stride[0] - 2 * padding[0] + ksize[0]   # 15
    assert yr.shape == (N, Cout, Ho, Ho) and yi.shape == (N, Cout, Ho, Ho)

    # Correctness vs. an independent pure-JAX f32 reference of the module.
    ref_r, ref_i = _reference_forward(
        xr, xi, (skip_r, skip_i), Wre, Wim,
        bn_wrr, bn_wri, bn_wii, bn_br, bn_bi,
        stride, padding, eps, leaky_slope)
    np.testing.assert_allclose(np.asarray(yr), np.asarray(ref_r), rtol=3e-2, atol=3e-2)
    np.testing.assert_allclose(np.asarray(yi), np.asarray(ref_i), rtol=3e-2, atol=3e-2)

    print("KERNEL_OK")
</pallas_src>

<mosaic_0001>
module attributes {stable_mosaic.version = 11 : i64} {
  func.func @_gram_kernel(%arg0: i32, %arg1: memref<160x256xbf16, #tpu.memory_space<vmem>>, %arg2: memref<160x160xf32, #tpu.memory_space<vmem>>) attributes {dimension_semantics = [#tpu.dimension_semantics<arbitrary>], iteration_bounds = array<i64: 2>, scalar_prefetch = 0 : i64, scratch_operands = 0 : i64, tpu.core_type = #tpu.core_type<tc>, window_params = [{transform_indices = @transform_0, window_bounds = array<i64: 160, 256>}, {pipeline_mode = #tpu.pipeline_mode<synchronous>, transform_indices = @transform_1, window_bounds = array<i64: 160, 160>}]} {
    %c0_i32 = arith.constant 0 : i32
    %0 = arith.cmpi eq, %arg0, %c0_i32 : i32
    %1 = arith.extui %0 : i1 to i32
    %c0_i32_0 = arith.constant 0 : i32
    %2 = arith.cmpi ne, %1, %c0_i32_0 : i32
    scf.if %2 {
      %cst_6 = arith.constant 0.000000e+00 : f32
      %8 = vector.broadcast %cst_6 : f32 to vector<160x160xf32>
      %c0_7 = arith.constant 0 : index
      %c0_8 = arith.constant 0 : index
      %9 = vector.load %arg2[%c0_7, %c0_8] : memref<160x160xf32, #tpu.memory_space<vmem>>, vector<160x160xf32>
      tpu.vector_store %arg2[%c0_7, %c0_8], %8 {strides = array<i32>} : memref<160x160xf32, #tpu.memory_space<vmem>>, vector<160x160xf32>,
    } else {
    }
    %c0 = arith.constant 0 : index
    %c0_1 = arith.constant 0 : index
    %3 = vector.load %arg1[%c0, %c0_1] : memref<160x256xbf16, #tpu.memory_space<vmem>>, vector<160x256xbf16>
    %c0_2 = arith.constant 0 : index
    %c0_3 = arith.constant 0 : index
    %4 = vector.load %arg2[%c0_2, %c0_3] : memref<160x160xf32, #tpu.memory_space<vmem>>, vector<160x160xf32>
    %cst = arith.constant dense<0.000000e+00> : vector<160x160xf32>
    %5 = tpu.matmul %3, %3, %cst {dimension_numbers = #tpu.dot_dimension_numbers<[1], [1], [0], [0], [0, 0, 1, 0], [], []>} : vector<160x256xbf16>, vector<160x256xbf16>, vector<160x160xf32> -> vector<160x160xf32>
    %6 = arith.addf %4, %5 : vector<160x160xf32>
    %c0_4 = arith.constant 0 : index
    %c0_5 = arith.constant 0 : index
    %7 = vector.load %arg2[%c0_4, %c0_5] : memref<160x160xf32, #tpu.memory_space<vmem>>, vector<160x160xf32>
    tpu.vector_store %arg2[%c0_4, %c0_5], %6 {strides = array<i32>} : memref<160x160xf32, #tpu.memory_space<vmem>>, vector<160x160xf32>,
    return
  }
  func.func @transform_0(%arg0: i32) -> (i32, i32) {
    %c0_i32 = arith.constant 0 : i32
    %c0_i32_0 = arith.constant 0 : i32
    return %c0_i32, %arg0 : i32, i32
  }
  func.func @transform_1(%arg0: i32) -> (i32, i32) {
    %c0_i32 = arith.constant 0 : i32
    %c0_i32_0 = arith.constant 0 : i32
    %c0_i32_1 = arith.constant 0 : i32
    return %c0_i32, %c0_i32_0 : i32, i32
  }
}

module attributes {stable_mosaic.version = 11 : i64} {
  func.func @_apply_kernel(%arg0: i32, %arg1: memref<8x160xbf16, #tpu.memory_space<vmem>>, %arg2: memref<160x256xbf16, #tpu.memory_space<vmem>>, %arg3: memref<8x256xf32, #tpu.memory_space<vmem>>) attributes {dimension_semantics = [#tpu.dimension_semantics<parallel>], iteration_bounds = array<i64: 2>, scalar_prefetch = 0 : i64, scratch_operands = 0 : i64, tpu.core_type = #tpu.core_type<tc>, window_params = [{pipeline_mode = #tpu.pipeline_mode<synchronous>, transform_indices = @transform_0, window_bounds = array<i64: 8, 160>}, {transform_indices = @transform_1, window_bounds = array<i64: 160, 256>}, {transform_indices = @transform_2, window_bounds = array<i64: 8, 256>}]} {
    %c0 = arith.constant 0 : index
    %c0_0 = arith.constant 0 : index
    %0 = vector.load %arg1[%c0, %c0_0] : memref<8x160xbf16, #tpu.memory_space<vmem>>, vector<8x160xbf16>
    %c0_1 = arith.constant 0 : index
    %c0_2 = arith.constant 0 : index
    %1 = vector.load %arg2[%c0_1, %c0_2] : memref<160x256xbf16, #tpu.memory_space<vmem>>, vector<160x256xbf16>
    %cst = arith.constant dense<0.000000e+00> : vector<8x256xf32>
    %2 = tpu.matmul %0, %1, %cst {dimension_numbers = #tpu.dot_dimension_numbers<[1], [0], [0], [1], [0, 0, 1, 1], [], []>} : vector<8x160xbf16>, vector<160x256xbf16>, vector<8x256xf32> -> vector<8x256xf32>
    %cst_3 = arith.constant 0.000000e+00 : f32
    %3 = vector.broadcast %cst_3 : f32 to vector<8x256xf32>
    %4 = arith.cmpf oge, %2, %3 : vector<8x256xf32>
    %cst_4 = arith.constant 1.000000e-01 : f32
    %5 = vector.broadcast %cst_4 : f32 to vector<8x256xf32>
    %6 = arith.mulf %5, %2 : vector<8x256xf32>
    %7 = arith.select %4, %2, %6 : vector<8x256xi1>, vector<8x256xf32>
    %c0_5 = arith.constant 0 : index
    %c0_6 = arith.constant 0 : index
    %8 = vector.load %arg3[%c0_5, %c0_6] : memref<8x256xf32, #tpu.memory_space<vmem>>, vector<8x256xf32>
    tpu.vector_store %arg3[%c0_5, %c0_6], %7 {strides = array<i32>} : memref<8x256xf32, #tpu.memory_space<vmem>>, vector<8x256xf32>,
    return
  }
  func.func @transform_0(%arg0: i32) -> (i32, i32) {
    %c0_i32 = arith.constant 0 : i32
    %c0_i32_0 = arith.constant 0 : i32
    %c0_i32_1 = arith.constant 0 : i32
    return %c0_i32, %c0_i32_0 : i32, i32
  }
  func.func @transform_1(%arg0: i32) -> (i32, i32) {
    %c0_i32 = arith.constant 0 : i32
    %c0_i32_0 = arith.constant 0 : i32
    return %c0_i32, %arg0 : i32, i32
  }
  func.func @transform_2(%arg0: i32) -> (i32, i32) {
    %c0_i32 = arith.constant 0 : i32
    %c0_i32_0 = arith.constant 0 : i32
    return %c0_i32, %arg0 : i32, i32
  }
}

</mosaic_0001>

<bundles_post_ra>
// kernel: neg.2
= control target key start
LH: loop header
LB: loop body
LE: loop exit
PB: predicated region body
PF: predicated region fallthrough
CT: control target
= control target key end

     0   :  { %s24_s0 = inlined_call_operand.vmem [shape: f32[72,4], index: 0, kind: input, shape index: {}]   ;;  %s25_s1 = inlined_call_operand.vmem [shape: f32[72,4], index: 1, kind: output, shape index: {}]  }
   0x1   :  { %v2_v0 = vld [vmem:[%s24_s0] sm:$0xf] }
   0x2   :  { %v5_v1 = vxor.u32 2147483648, %v2_v0 }
   0x4   :  { %7 = vst [vmem:[%s25_s1] sm:$0xf] %v5_v1 }

// kernel: dcu_net_decoder_forward.2
= control target key start
LH: loop header
LB: loop body
LE: loop exit
PB: predicated region body
PF: predicated region fallthrough
CT: control target
= control target key end

     0   :  { %s944_s6 = smov 0   ;;  %s946_s7 = smov 0   ;;  %s1529_s0 = inlined_call_operand.vmem [shape: bf16[160,512], index: 0, kind: input, shape index: {}]   ;;  %s1530_s1 = inlined_call_operand.vmem [shape: f32[160,160], index: 1, kind: output, shape index: {}]  }
   0x1   :  { %s948_s8 = smov 0  }
   0x2 LB: > { %s772_s9 = sadd.s32 4294967295, %s931_s8   ;;  %s961_s10 = sadd.s32 1, %s931_s8   ;;  %s931_s8 = sphi %s948_s8, %s1533_s8   ;;  %s927_s7 = sphi %s946_s7, %s1532_s7   ;;  %s923_s6 = sphi %s944_s6, %s1531_s6  }
   0x3   : > { %s15_s11 = ssub.s32 %s931_s8, %s961_s10  ;;  %s18_s12 = sadd.s32 1, %s927_s7 }
   0x4   : > { %p16_p0 = scmp.eq.s32.totalorder %s15_s11, 0  ;;  %p25_p1 = scmp.ne.s32.totalorder %s927_s7, %s923_s6 }
   0x5   : > { %p26_p2 = scmp.eq.s32.totalorder %s931_s8, 0  ;;  %p774_p4 = scmp.ge.s32.totalorder %s931_s8, 2 }
   0x6   : > { %s970_s13 = scalar_select %p16_p0, %s927_s7, %s18_s12  }
   0x7   : > { %p27_p3 = por %p26_p2, %p25_p1  ;;  %72 = sbr.rel (%p774_p4) target bundleno = 36 (0x24), region = 16 }
   0xc   : > { %75 = sbr.rel (!%p27_p3) target bundleno = 36 (0x24), region = 20  ;;  %s77_s14 = sand.u32 (%p27_p3), 1, %s927_s7  }
   0xd   : > { %s861_s15 = sshll.u32 (%p27_p3), %s931_s8, 3  ;;  %s882_s16 = smul.u32 (%p27_p3), 160, %s77_s14 }
   0xe   : > { %s978_s19 = scalar_lea.vmem (%p27_p3), %s1529_s0, %s861_s15 }
   0xf   : > { %v149_v0 = vld [vmem:[%s978_s19] sm:$0xff] (%p27_p3)  ;;  %v151_v1 = vld [vmem:[%s978_s19 + $0x10] sm:$0xff] (%p27_p3)  ;;  %s983_s20 = scalar_lea.vmem (%p27_p3), [#allocation2], %s882_s16 }
  0x10   : > { %v153_v2 = vld [vmem:[%s978_s19 + $0x20] sm:$0xff] (%p27_p3)  ;;  %150 = vst [vmem:[%s983_s20] sm:$0xff] (%p27_p3), %v149_v0  ;;  %v155_v3 = vld [vmem:[%s978_s19 + $0x30] sm:$0xff] (%p27_p3) }
  0x11   : > { %152 = vst [vmem:[%s983_s20 + $0x8] sm:$0xff] %v151_v1  ;;  %v157_v4 = vld [vmem:[%s978_s19 + $0x40] sm:$0xff]  ;;  %v159_v5 = vld [vmem:[%s978_s19 + $0x50] sm:$0xff] }
  0x12   : > { %154 = vst [vmem:[%s983_s20 + $0x10] sm:$0xff] %v153_v2  ;;  %v161_v6 = vld [vmem:[%s978_s19 + $0x60] sm:$0xff]  ;;  %v163_v7 = vld [vmem:[%s978_s19 + $0x70] sm:$0xff] }
  0x13   : > { %156 = vst [vmem:[%s983_s20 + $0x18] sm:$0xff] %v155_v3  ;;  %v165_v8 = vld [vmem:[%s978_s19 + $0x80] sm:$0xff]  ;;  %v167_v9 = vld [vmem:[%s978_s19 + $0x90] sm:$0xff] }
  0x14   : > { %158 = vst [vmem:[%s983_s20 + $0x20] sm:$0xff] %v157_v4  ;;  %v169_v10 = vld [vmem:[%s978_s19 + $0xa0] sm:$0xff]  ;;  %v171_v11 = vld [vmem:[%s978_s19 + $0xb0] sm:$0xff] }
  0x15   : > { %160 = vst [vmem:[%s983_s20 + $0x28] sm:$0xff] %v159_v5  ;;  %v173_v12 = vld [vmem:[%s978_s19 + $0xc0] sm:$0xff]  ;;  %v175_v13 = vld [vmem:[%s978_s19 + $0xd0] sm:$0xff] }
  0x16   : > { %162 = vst [vmem:[%s983_s20 + $0x30] sm:$0xff] %v161_v6  ;;  %v177_v14 = vld [vmem:[%s978_s19 + $0xe0] sm:$0xff]  ;;  %v179_v15 = vld [vmem:[%s978_s19 + $0xf0] sm:$0xff] }
  0x17   : > { %164 = vst [vmem:[%s983_s20 + $0x38] sm:$0xff] %v163_v7  ;;  %v181_v16 = vld [vmem:[%s978_s19 + $0x100] sm:$0xff]  ;;  %v183_v17 = vld [vmem:[%s978_s19 + $0x110] sm:$0xff] }
  0x18   : > { %166 = vst [vmem:[%s983_s20 + $0x40] sm:$0xff] %v165_v8  ;;  %v185_v18 = vld [vmem:[%s978_s19 + $0x120] sm:$0xff]  ;;  %v187_v19 = vld [vmem:[%s978_s19 + $0x130] sm:$0xff] }
  0x19   : > { %168 = vst [vmem:[%s983_s20 + $0x48] sm:$0xff] %v167_v9 }
  0x1a   : > { %170 = vst [vmem:[%s983_s20 + $0x50] sm:$0xff] %v169_v10 }
  0x1b   : > { %172 = vst [vmem:[%s983_s20 + $0x58] sm:$0xff] %v171_v11 }
  0x1c   : > { %174 = vst [vmem:[%s983_s20 + $0x60] sm:$0xff] %v173_v12 }
  0x1d   : > { %176 = vst [vmem:[%s983_s20 + $0x68] sm:$0xff] %v175_v13 }
  0x1e   : > { %178 = vst [vmem:[%s983_s20 + $0x70] sm:$0xff] %v177_v14 }
  0x1f   : > { %180 = vst [vmem:[%s983_s20 + $0x78] sm:$0xff] %v179_v15 }
  0x20   : > { %182 = vst [vmem:[%s983_s20 + $0x80] sm:$0xff] %v181_v16 }
  0x21   : > { %184 = vst [vmem:[%s983_s20 + $0x88] sm:$0xff] %v183_v17 }
  0x22   : > { %186 = vst [vmem:[%s983_s20 + $0x90] sm:$0xff] %v185_v18 }
  0x23   : > { %188 = vst [vmem:[%s983_s20 + $0x98] sm:$0xff] %v187_v19 }
  0x24 PF: > { %p777_p5 = scmp.ge.s32.totalorder %s931_s8, 1  ;;  %p193_p6 = scmp.lt.s32.totalorder %s931_s8, 3 }
  0x26   : > { %p194_p7 = pnand %p777_p5, %p193_p6 }
  0x27   : > { %s200_s21 = sand.u32 (!%p194_p7), 1, %s923_s6   ;;  %p778_p8 = scmp.ne.s32.totalorder (!%p194_p7), %s772_s9, 0 }
  0x28   : > { %197 = sbr.rel (%p194_p7) target bundleno = 441 (0x1b9), region = 58 }
  0x29   : > { %s883_s22 = smul.u32 (!%p194_p7), 160, %s200_s21 }
  0x2b   : > { %s1025_s23 = scalar_lea.vmem (!%p194_p7), [#allocation2], %s883_s22 }
  0x2d   : > { %219 = sbr.rel (%p778_p8) target bundleno = 91 (0x5b), region = 66 }
  0x32   : > { %v933_v20 = vmov 0.0   ;;  %vm221_vm0 = vcmask 261120  }
  0x33   : > { %220 = vst [vmem:[%s1530_s1] sm:$0xff] %v933_v20 }
  0x34   : > { %223 = vst [vmem:[%s1530_s1 + $0x10] sm:$0xff] %v933_v20 }
  0x35   : > { %225 = vst [vmem:[%s1530_s1 + $0x20] sm:$0xff] %v933_v20 }
  0x36   : > { %227 = vst [vmem:[%s1530_s1 + $0x30] sm:$0xff] %v933_v20 }
  0x37   : > { %229 = vst [vmem:[%s1530_s1 + $0x40] sm:$0xff] %v933_v20 }
  0x38   : > { %231 = vst [vmem:[%s1530_s1 + $0x50] sm:$0xff] %v933_v20 }
  0x39   : > { %233 = vst [vmem:[%s1530_s1 + $0x60] sm:$0xff] %v933_v20 }
  0x3a   : > { %235 = vst [vmem:[%s1530_s1 + $0x70] sm:$0xff] %v933_v20 }
  0x3b   : > { %237 = vst [vmem:[%s1530_s1 + $0x80] sm:$0xff] %v933_v20 }
  0x3c   : > { %239 = vst [vmem:[%s1530_s1 + $0x90] sm:$0xff] %v933_v20 }
  0x3d   : > { %241 = vst [vmem:[%s1530_s1 + $0xa0] sm:$0xff] %v933_v20 }
  0x3e   : > { %243 = vst [vmem:[%s1530_s1 + $0xb0] sm:$0xff] %v933_v20 }
  0x3f   : > { %245 = vst [vmem:[%s1530_s1 + $0xc0] sm:$0xff] %v933_v20 }
  0x40   : > { %247 = vst [vmem:[%s1530_s1 + $0xd0] sm:$0xff] %v933_v20 }
  0x41   : > { %249 = vst [vmem:[%s1530_s1 + $0xe0] sm:$0xff] %v933_v20 }
  0x42   : > { %251 = vst [vmem:[%s1530_s1 + $0xf0] sm:$0xff] %v933_v20 }
  0x43   : > { %253 = vst [vmem:[%s1530_s1 + $0x100] sm:$0xff] %v933_v20 }
  0x44   : > { %255 = vst [vmem:[%s1530_s1 + $0x110] sm:$0xff] %v933_v20 }
  0x45   : > { %257 = vst [vmem:[%s1530_s1 + $0x120] sm:$0xff] %v933_v20 }
  0x46   : > { %259 = vst [vmem:[%s1530_s1 + $0x130] sm:$0xff] %v933_v20 }
  0x47   : > { %222 = vst.msk [vmem:[%s1530_s1 + $0x8] sm:$0xff] %vm221_vm0, %v933_v20 }
  0x48   : > { %224 = vst.msk [vmem:[%s1530_s1 + $0x18] sm:$0xff] %vm221_vm0, %v933_v20 }
  0x49   : > { %226 = vst.msk [vmem:[%s1530_s1 + $0x28] sm:$0xff] %vm221_vm0, %v933_v20 }
  0x4a   : > { %228 = vst.msk [vmem:[%s1530_s1 + $0x38] sm:$0xff] %vm221_vm0, %v933_v20 }
  0x4b   : > { %230 = vst.msk [vmem:[%s1530_s1 + $0x48] sm:$0xff] %vm221_vm0, %v933_v20 }
  0x4c   : > { %232 = vst.msk [vmem:[%s1530_s1 + $0x58] sm:$0xff] %vm221_vm0, %v933_v20 }
  0x4d   : > { %234 = vst.msk [vmem:[%s1530_s1 + $0x68] sm:$0xff] %vm221_vm0, %v933_v20 }
  0x4e   : > { %236 = vst.msk [vmem:[%s1530_s1 + $0x78] sm:$0xff] %vm221_vm0, %v933_v20 }
  0x4f   : > { %238 = vst.msk [vmem:[%s1530_s1 + $0x88] sm:$0xff] %vm221_vm0, %v933_v20 }
  0x50   : > { %240 = vst.msk [vmem:[%s1530_s1 + $0x98] sm:$0xff] %vm221_vm0, %v933_v20 }
  0x51   : > { %242 = vst.msk [vmem:[%s1530_s1 + $0xa8] sm:$0xff] %vm221_vm0, %v933_v20 }
  0x52   : > { %244 = vst.msk [vmem:[%s1530_s1 + $0xb8] sm:$0xff] %vm221_vm0, %v933_v20 }
  0x53   : > { %246 = vst.msk [vmem:[%s1530_s1 + $0xc8] sm:$0xff] %vm221_vm0, %v933_v20 }
  0x54   : > { %248 = vst.msk [vmem:[%s1530_s1 + $0xd8] sm:$0xff] %vm221_vm0, %v933_v20 }
  0x55   : > { %250 = vst.msk [vmem:[%s1530_s1 + $0xe8] sm:$0xff] %vm221_vm0, %v933_v20 }
  0x56   : > { %252 = vst.msk [vmem:[%s1530_s1 + $0xf8] sm:$0xff] %vm221_vm0, %v933_v20 }
  0x57   : > { %254 = vst.msk [vmem:[%s1530_s1 + $0x108] sm:$0xff] %vm221_vm0, %v933_v20 }
  0x58   : > { %256 = vst.msk [vmem:[%s1530_s1 + $0x118] sm:$0xff] %vm221_vm0, %v933_v20 }
  0x59   : > { %258 = vst.msk [vmem:[%s1530_s1 + $0x128] sm:$0xff] %vm221_vm0, %v933_v20 }
  0x5a   : > { %260 = vst.msk [vmem:[%s1530_s1 + $0x138] sm:$0xff] %vm221_vm0, %v933_v20 }
  0x5b PF: > { %v837_v21 = vld [vmem:[%s1025_s23 + $0x70] sm:$0xf]  ;;  %v877_v22 = vld [vmem:[%s1025_s23 + $0x74] sm:$0xf0]  ;;  %v876_v23 = vld [vmem:[%s1025_s23 + $0x74] sm:$0xf] }
  0x5c   : > { %v1172_v24 = vor.u32 %v877_v22, %v837_v21  ;;  %v839_v25 = vld [vmem:[%s1025_s23 + $0x78] sm:$0xf0]  ;;  %v829_v27 = vld [vmem:[%s1025_s23 + $0x60] sm:$0xf]  ;;  %v875_v28 = vld [vmem:[%s1025_s23 + $0x64] sm:$0xf0] }
  0x5d   : > { %v1175_v26 = vor.u32 %v876_v23, %v839_v25  ;;  %v874_v29 = vld [vmem:[%s1025_s23 + $0x64] sm:$0xf]  ;;  %v831_v30 = vld [vmem:[%s1025_s23 + $0x68] sm:$0xf0]  ;;  %v853_v31 = vld [vmem:[%s1025_s23 + $0x90] sm:$0xf]  ;;  %v1184_v32 = vor.u32 %v875_v28, %v829_v27 }
  0x5e   : > { %421 = vmatpush.bf16.xpose.msra.mxu0 %v1172_v24  ;;  %v881_v33 = vld [vmem:[%s1025_s23 + $0x94] sm:$0xf0]  ;;  %v880_v34 = vld [vmem:[%s1025_s23 + $0x94] sm:$0xf]  ;;  %v855_v35 = vld [vmem:[%s1025_s23 + $0x98] sm:$0xf0]  ;;  %v1189_v36 = vor.u32 %v874_v29, %v831_v30 }
  0x5f   : > { %480 = vmatpush.bf16.xpose.msra.mxu1 %v1175_v26  ;;  %v1191_v37 = vor.u32 %v881_v33, %v853_v31  ;;  %v1193_v38 = vor.u32 %v880_v34, %v855_v35  ;;  %v845_v39 = vld [vmem:[%s1025_s23 + $0x80] sm:$0xf]  ;;  %v879_v40 = vld [vmem:[%s1025_s23 + $0x84] sm:$0xf0]  ;;  %v878_v41 = vld [vmem:[%s1025_s23 + $0x84] sm:$0xf] }
  0x60   : > { %v821_v42 = vld [vmem:[%s1025_s23 + $0x50] sm:$0xf]  ;;  %v873_v43 = vld [vmem:[%s1025_s23 + $0x54] sm:$0xf0]  ;;  %v847_v44 = vld [vmem:[%s1025_s23 + $0x88] sm:$0xf0]  ;;  %v1207_v47 = vor.u32 %v879_v40, %v845_v39 }
  0x61   : > { %545 = vmatpush.bf16.xpose.msra.mxu2 %v1191_v37  ;;  %604 = vmatpush.bf16.xpose.msra.mxu3 %v1193_v38  ;;  %v872_v45 = vld [vmem:[%s1025_s23 + $0x54] sm:$0xf]  ;;  %v823_v46 = vld [vmem:[%s1025_s23 + $0x58] sm:$0xf0]  ;;  %v1209_v48 = vor.u32 %v878_v41, %v847_v44  ;;  %v1211_v49 = vor.u32 %v873_v43, %v821_v42  ;;  %v781_v51 = vld [vmem:[%s1025_s23] sm:$0xf] }
  0x62   : > { %v1213_v50 = vor.u32 %v872_v45, %v823_v46  ;;  %v863_v52 = vld [vmem:[%s1025_s23 + $0x4] sm:$0xf0]  ;;  %v862_v53 = vld [vmem:[%s1025_s23 + $0x4] sm:$0xf]  ;;  %v783_v54 = vld [vmem:[%s1025_s23 + $0x8] sm:$0xf0] }
  0x63   : > { %v813_v55 = vld [vmem:[%s1025_s23 + $0x40] sm:$0xf]  ;;  %v871_v56 = vld [vmem:[%s1025_s23 + $0x44] sm:$0xf0]  ;;  %v870_v57 = vld [vmem:[%s1025_s23 + $0x44] sm:$0xf]  ;;  %v782_v59 = vor.u32 %v863_v52, %v781_v51  ;;  %v786_v60 = vor.u32 %v862_v53, %v783_v54 }
  0x64   : > { %v815_v58 = vld [vmem:[%s1025_s23 + $0x48] sm:$0xf0]  ;;  %v814_v61 = vor.u32 %v871_v56, %v813_v55  ;;  %v805_v63 = vld [vmem:[%s1025_s23 + $0x30] sm:$0xf]  ;;  %v869_v0 = vld [vmem:[%s1025_s23 + $0x34] sm:$0xf0] }
  0x65   : > { %v818_v62 = vor.u32 %v870_v57, %v815_v58  ;;  %v868_v1 = vld [vmem:[%s1025_s23 + $0x34] sm:$0xf]  ;;  %v807_v2 = vld [vmem:[%s1025_s23 + $0x38] sm:$0xf0]  ;;  %v806_v3 = vor.u32 %v869_v0, %v805_v63  ;;  %v797_v5 = vld [vmem:[%s1025_s23 + $0x20] sm:$0xf] }
  0x66   : > { %422 = vmatpush.bf16.xpose.msra.mxu0 %v1184_v32  ;;  %v810_v4 = vor.u32 %v868_v1, %v807_v2  ;;  %v867_v6 = vld [vmem:[%s1025_s23 + $0x24] sm:$0xf0]  ;;  %v789_v7 = vld [vmem:[%s1025_s23 + $0x10] sm:$0xf]  ;;  %v865_v8 = vld [vmem:[%s1025_s23 + $0x14] sm:$0xf0] }
  0x67   : > { %481 = vmatpush.bf16.xpose.msra.mxu1 %v1189_v36  ;;  %v864_v9 = vld [vmem:[%s1025_s23 + $0x14] sm:$0xf]  ;;  %v791_v10 = vld [vmem:[%s1025_s23 + $0x18] sm:$0xf0]  ;;  %v866_v11 = vld [vmem:[%s1025_s23 + $0x24] sm:$0xf]  ;;  %v798_v13 = vor.u32 %v867_v6, %v797_v5  ;;  %v790_v14 = vor.u32 %v865_v8, %v789_v7 }
  0x68   : > { %v799_v12 = vld [vmem:[%s1025_s23 + $0x28] sm:$0xf0]  ;;  %v794_v15 = vor.u32 %v864_v9, %v791_v10  ;;  %vm698_vm1 = vcmask 261120   ;;  %v284_v23 = vld [vmem:[%s1530_s1 + $0x18] sm:$0xff]  ;;  %v281_v45 = vld [vmem:[%s1530_s1] sm:$0xff] }
  0x69   : > { %546 = vmatpush.bf16.xpose.msra.mxu2 %v1207_v47  ;;  %605 = vmatpush.bf16.xpose.msra.mxu3 %v1209_v48  ;;  %v802_v16 = vor.u32 %v866_v11, %v799_v12  ;;  %v282_v18 = vld [vmem:[%s1530_s1 + $0x8] sm:$0xff]  ;;  %v288_v35 = vld [vmem:[%s1530_s1 + $0x38] sm:$0xff]  ;;  %v285_v1 = vld [vmem:[%s1530_s1 + $0x20] sm:$0xff] }
  0x6a   : > { %v286_v31 = vld [vmem:[%s1530_s1 + $0x28] sm:$0xff]  ;;  %v292_v52 = vld [vmem:[%s1530_s1 + $0x58] sm:$0xff] }
  0x6b   : > { %v296_v6 = vld [vmem:[%s1530_s1 + $0x78] sm:$0xff] }
  0x6e   : > { %423 = vmatpush.bf16.xpose.msra.mxu0 %v1211_v49 }
  0x6f   : > { %482 = vmatpush.bf16.xpose.msra.mxu1 %v1213_v50 }
  0x70   : > { %547 = vmatmul.bf16.vlgmr.msra.gmra.mxu2 %v782_v59  ;;  %606 = vmatmul.bf16.vlgmr.msra.gmra.mxu3 %v786_v60 }
  0x76   : > { %424 = vmatpush.bf16.xpose.msra.mxu0 %v814_v61 }
  0x77   : > { %483 = vmatpush.bf16.xpose.msra.mxu1 %v818_v62 }
  0x7e   : > { %425 = vmatpush.bf16.xpose.msra.mxu0 %v806_v3 }
  0x7f   : > { %484 = vmatpush.bf16.xpose.msra.mxu1 %v810_v4 }
  0x80   : > { %552 = vmatmul.bf16.gmra.mxu2 %v790_v14  ;;  %611 = vmatmul.bf16.gmra.mxu3 %v794_v15 }
  0x86   : > { %426 = vmatpush.bf16.xpose.msra.mxu0 %v798_v13 }
  0x87   : > { %485 = vmatpush.bf16.xpose.msra.mxu1 %v802_v16 }
  0x8e   : > { %427 = vmatpush.bf16.xpose.msra.mxu0 %v790_v14 }
  0x8f   : > { %486 = vmatpush.bf16.xpose.msra.mxu1 %v794_v15 }
  0x90   : > { %557 = vmatmul.bf16.gmra.mxu2 %v798_v13  ;;  %616 = vmatmul.bf16.gmra.mxu3 %v802_v16 }
  0x96   : > { %428 = vmatpush.bf16.xpose.msra.mxu0 %v782_v59 }
  0x97   : > { %487 = vmatpush.bf16.xpose.msra.mxu1 %v786_v60 }
  0x9d   : > { %429 = vmatmul.bf16.vlgmr.msra.gmra.mxu0 %v782_v59 }
  0x9e   : > { %488 = vmatmul.bf16.vlgmr.msra.gmra.mxu1 %v786_v60 }
  0xa0   : > { %562 = vmatmul.bf16.gmra.mxu2 %v806_v3  ;;  %621 = vmatmul.bf16.gmra.mxu3 %v810_v4 }
  0xad   : > { %434 = vmatmul.bf16.gmra.mxu0 %v790_v14 }
  0xae   : > { %493 = vmatmul.bf16.gmra.mxu1 %v794_v15  ;;  %v298_v15 = vld [vmem:[%s1530_s1 + $0x88] sm:$0xff] }
  0xb0   : > { %567 = vmatmul.bf16.gmra.mxu2 %v814_v61  ;;  %626 = vmatmul.bf16.gmra.mxu3 %v818_v62 }
  0xbd   : > { %439 = vmatmul.bf16.gmra.mxu0 %v798_v13 }
  0xbe   : > { %498 = vmatmul.bf16.gmra.mxu1 %v802_v16 }
  0xc0   : > { %572 = vmatmul.bf16.gmra.mxu2 %v1211_v49  ;;  %631 = vmatmul.bf16.gmra.mxu3 %v1213_v50 }
  0xcd   : > { %444 = vmatmul.bf16.gmra.mxu0 %v806_v3 }
  0xce   : > { %503 = vmatmul.bf16.gmra.mxu1 %v810_v4 }
  0xd0   : > { %577 = vmatmul.bf16.gmra.mxu2 %v1184_v32  ;;  %636 = vmatmul.bf16.gmra.mxu3 %v1189_v36 }
  0xdd   : > { %449 = vmatmul.bf16.gmra.mxu0 %v814_v61  ;;  %v294_v61 = vld [vmem:[%s1530_s1 + $0x68] sm:$0xff] }
  0xde   : > { %508 = vmatmul.bf16.gmra.mxu1 %v818_v62 }
  0xe0   : > { %582 = vmatmul.bf16.gmra.mxu2 %v1172_v24  ;;  %641 = vmatmul.bf16.gmra.mxu3 %v1175_v26 }
  0xed   : > { %454 = vmatmul.bf16.gmra.mxu0 %v1211_v49 }
  0xee   : > { %513 = vmatmul.bf16.gmra.mxu1 %v1213_v50 }
  0xf0   : > { %587 = vmatmul.bf16.gmra.mxu2 %v1207_v47  ;;  %646 = vmatmul.bf16.gmra.mxu3 %v1209_v48 }
  0xf3   : > { %v548_v17 = vpop.f32.mrf.mxu2  ;;  %v607_v19 = vpop.f32.mrf.mxu3 }
  0xf4   : > { %v608_v20 = vadd.f32 %v607_v19, %v548_v17  ;;  %v289_v19 = vld [vmem:[%s1530_s1 + $0x40] sm:$0xff] }
  0xf6   : > { %v658_v21 = vadd.f32 %v608_v20, %v282_v18 }
  0xf8   : > { %699 = vst.msk [vmem:[%s1530_s1 + $0x8] sm:$0xff] %vm698_vm1, %v658_v21 }
  0xfb   : > { %v550_v22 = vpop.f32.mrf.mxu2  ;;  %v609_v25 = vpop.f32.mrf.mxu3 }
  0xfc   : > { %v610_v27 = vadd.f32 %v609_v25, %v550_v22  ;;  %v300_v25 = vld [vmem:[%s1530_s1 + $0x98] sm:$0xff] }
  0xfd   : > { %459 = vmatmul.bf16.gmra.mxu0 %v1184_v32 }
  0xfe   : > { %518 = vmatmul.bf16.gmra.mxu1 %v1189_v36  ;;  %v660_v28 = vadd.f32 %v610_v27, %v284_v23 }
 0x100   : > { %701 = vst.msk [vmem:[%s1530_s1 + $0x18] sm:$0xff] %vm698_vm1, %v660_v28  ;;  %592 = vmatmul.bf16.gmra.mxu2 %v1191_v37  ;;  %651 = vmatmul.bf16.gmra.mxu3 %v1193_v38 }
 0x103   : > { %v553_v29 = vpop.f32.mrf.mxu2  ;;  %v612_v30 = vpop.f32.mrf.mxu3 }
 0x104   : > { %v613_v32 = vadd.f32 %v612_v30, %v553_v29 }
 0x106   : > { %v662_v33 = vadd.f32 %v613_v32, %v286_v31  ;;  %v291_v31 = vld [vmem:[%s1530_s1 + $0x50] sm:$0xff] }
 0x108   : > { %703 = vst.msk [vmem:[%s1530_s1 + $0x28] sm:$0xff] %vm698_vm1, %v662_v33 }
 0x10b   : > { %v555_v34 = vpop.f32.mrf.mxu2  ;;  %v614_v36 = vpop.f32.mrf.mxu3 }
 0x10c   : > { %v615_v39 = vadd.f32 %v614_v36, %v555_v34 }
 0x10d   : > { %464 = vmatmul.bf16.gmra.mxu0 %v1172_v24  ;;  %v290_v24 = vld [vmem:[%s1530_s1 + $0x48] sm:$0xff] }
 0x10e   : > { %523 = vmatmul.bf16.gmra.mxu1 %v1175_v26  ;;  %v664_v40 = vadd.f32 %v615_v39, %v288_v35  ;;  %v302_v39 = vld [vmem:[%s1530_s1 + $0xa8] sm:$0xff] }
 0x110   : > { %705 = vst.msk [vmem:[%s1530_s1 + $0x38] sm:$0xff] %vm698_vm1, %v664_v40 }
 0x113   : > { %v558_v41 = vpop.f32.mrf.mxu2  ;;  %v617_v42 = vpop.f32.mrf.mxu3 }
 0x114   : > { %v618_v26 = vadd.f32 %v617_v42, %v558_v41 }
 0x116   : > { %v666_v44 = vadd.f32 %v618_v26, %v290_v24  ;;  %v293_v24 = vld [vmem:[%s1530_s1 + $0x60] sm:$0xff] }
 0x118   : > { %707 = vst.msk [vmem:[%s1530_s1 + $0x48] sm:$0xff] %vm698_vm1, %v666_v44 }
 0x11a   : > { %v430_v43 = vpop.f32.mrf.mxu0 }
 0x11b   : > { %v489_v46 = vpop.f32.mrf.mxu1  ;;  %v560_v51 = vpop.f32.mrf.mxu2 }
 0x11c   : > { %v490_v49 = vadd.f32 %v489_v46, %v430_v43  ;;  %v619_v53 = vpop.f32.mrf.mxu3  ;;  %v304_v46 = vld [vmem:[%s1530_s1 + $0xb8] sm:$0xff] }
 0x11d   : > { %469 = vmatmul.bf16.gmra.mxu0 %v1207_v47  ;;  %v620_v54 = vadd.f32 %v619_v53, %v560_v51  ;;  %v283_v47 = vld [vmem:[%s1530_s1 + $0x10] sm:$0xff] }
 0x11e   : > { %v657_v50 = vadd.f32 %v490_v49, %v281_v45  ;;  %528 = vmatmul.bf16.gmra.mxu1 %v1209_v48  ;;  %v295_v53 = vld [vmem:[%s1530_s1 + $0x70] sm:$0xff] }
 0x11f   : > { %v668_v56 = vadd.f32 %v620_v54, %v292_v52 }
 0x120   : > { %697 = vst [vmem:[%s1530_s1] sm:$0xff] %v657_v50 }
 0x121   : > { %709 = vst.msk [vmem:[%s1530_s1 + $0x58] sm:$0xff] %vm698_vm1, %v668_v56 }
 0x122   : > { %v432_v55 = vpop.f32.mrf.mxu0 }
 0x123   : > { %v491_v57 = vpop.f32.mrf.mxu1  ;;  %v563_v59 = vpop.f32.mrf.mxu2 }
 0x124   : > { %v492_v58 = vadd.f32 %v491_v57, %v432_v55  ;;  %v622_v60 = vpop.f32.mrf.mxu3 }
 0x125   : > { %v623_v62 = vadd.f32 %v622_v60, %v563_v59 }
 0x126   : > { %v659_v48 = vadd.f32 %v492_v58, %v283_v47  ;;  %v306_v58 = vld [vmem:[%s1530_s1 + $0xc8] sm:$0xff] }
 0x127   : > { %v670_v0 = vadd.f32 %v623_v62, %v294_v61  ;;  %v297_v61 = vld [vmem:[%s1530_s1 + $0x80] sm:$0xff] }
 0x128   : > { %700 = vst [vmem:[%s1530_s1 + $0x10] sm:$0xff] %v659_v48 }
 0x129   : > { %711 = vst.msk [vmem:[%s1530_s1 + $0x68] sm:$0xff] %vm698_vm1, %v670_v0 }
 0x12a   : > { %v435_v63 = vpop.f32.mrf.mxu0 }
 0x12b   : > { %v494_v2 = vpop.f32.mrf.mxu1  ;;  %v565_v5 = vpop.f32.mrf.mxu2 }
 0x12c   : > { %v495_v3 = vadd.f32 %v494_v2, %v435_v63  ;;  %v624_v7 = vpop.f32.mrf.mxu3  ;;  %v308_v2 = vld [vmem:[%s1530_s1 + $0xd8] sm:$0xff] }
 0x12d   : > { %474 = vmatmul.bf16.gmra.mxu0 %v1191_v37  ;;  %v625_v8 = vadd.f32 %v624_v7, %v565_v5  ;;  %v287_v37 = vld [vmem:[%s1530_s1 + $0x30] sm:$0xff] }
 0x12e   : > { %v661_v4 = vadd.f32 %v495_v3, %v285_v1  ;;  %533 = vmatmul.bf16.gmra.mxu1 %v1193_v38  ;;  %v299_v7 = vld [vmem:[%s1530_s1 + $0x90] sm:$0xff] }
 0x12f   : > { %v672_v10 = vadd.f32 %v625_v8, %v296_v6 }
 0x130   : > { %702 = vst [vmem:[%s1530_s1 + $0x20] sm:$0xff] %v661_v4 }
 0x131   : > { %713 = vst.msk [vmem:[%s1530_s1 + $0x78] sm:$0xff] %vm698_vm1, %v672_v10 }
 0x132   : > { %v437_v9 = vpop.f32.mrf.mxu0 }
 0x133   : > { %v496_v11 = vpop.f32.mrf.mxu1  ;;  %v568_v13 = vpop.f32.mrf.mxu2 }
 0x134   : > { %v497_v12 = vadd.f32 %v496_v11, %v437_v9  ;;  %v627_v14 = vpop.f32.mrf.mxu3 }
 0x135   : > { %v628_v16 = vadd.f32 %v627_v14, %v568_v13 }
 0x136   : > { %v663_v38 = vadd.f32 %v497_v12, %v287_v37  ;;  %v310_v12 = vld [vmem:[%s1530_s1 + $0xe8] sm:$0xff] }
 0x137   : > { %v674_v18 = vadd.f32 %v628_v16, %v298_v15  ;;  %v301_v15 = vld [vmem:[%s1530_s1 + $0xa0] sm:$0xff] }
 0x138   : > { %704 = vst [vmem:[%s1530_s1 + $0x30] sm:$0xff] %v663_v38 }
 0x139   : > { %715 = vst.msk [vmem:[%s1530_s1 + $0x88] sm:$0xff] %vm698_vm1, %v674_v18 }
 0x13a   : > { %v440_v17 = vpop.f32.mrf.mxu0 }
 0x13b   : > { %v499_v20 = vpop.f32.mrf.mxu1  ;;  %v570_v23 = vpop.f32.mrf.mxu2 }
 0x13c   : > { %v500_v21 = vadd.f32 %v499_v20, %v440_v17  ;;  %v629_v27 = vpop.f32.mrf.mxu3  ;;  %v312_v20 = vld [vmem:[%s1530_s1 + $0xf8] sm:$0xff] }
 0x13d   : > { %v630_v28 = vadd.f32 %v629_v27, %v570_v23  ;;  %v303_v27 = vld [vmem:[%s1530_s1 + $0xb0] sm:$0xff] }
 0x13e   : > { %v665_v22 = vadd.f32 %v500_v21, %v289_v19 }
 0x13f   : > { %v676_v30 = vadd.f32 %v630_v28, %v300_v25 }
 0x140   : > { %706 = vst [vmem:[%s1530_s1 + $0x40] sm:$0xff] %v665_v22 }
 0x141   : > { %717 = vst.msk [vmem:[%s1530_s1 + $0x98] sm:$0xff] %vm698_vm1, %v676_v30 }
 0x142   : > { %v442_v29 = vpop.f32.mrf.mxu0 }
 0x143   : > { %v501_v32 = vpop.f32.mrf.mxu1  ;;  %v573_v35 = vpop.f32.mrf.mxu2 }
 0x144   : > { %v502_v33 = vadd.f32 %v501_v32, %v442_v29  ;;  %v632_v36 = vpop.f32.mrf.mxu3 }
 0x145   : > { %v633_v40 = vadd.f32 %v632_v36, %v573_v35 }
 0x146   : > { %v667_v34 = vadd.f32 %v502_v33, %v291_v31  ;;  %v314_v33 = vld [vmem:[%s1530_s1 + $0x108] sm:$0xff] }
 0x147   : > { %v678_v42 = vadd.f32 %v633_v40, %v302_v39  ;;  %v305_v39 = vld [vmem:[%s1530_s1 + $0xc0] sm:$0xff] }
 0x148   : > { %708 = vst [vmem:[%s1530_s1 + $0x50] sm:$0xff] %v667_v34 }
 0x149   : > { %719 = vst.msk [vmem:[%s1530_s1 + $0xa8] sm:$0xff] %vm698_vm1, %v678_v42 }
 0x14a   : > { %v445_v41 = vpop.f32.mrf.mxu0 }
 0x14b   : > { %v504_v26 = vpop.f32.mrf.mxu1  ;;  %v575_v45 = vpop.f32.mrf.mxu2 }
 0x14c   : > { %v505_v43 = vadd.f32 %v504_v26, %v445_v41  ;;  %v634_v49 = vpop.f32.mrf.mxu3  ;;  %v316_v26 = vld [vmem:[%s1530_s1 + $0x118] sm:$0xff] }
 0x14d   : > { %v635_v50 = vadd.f32 %v634_v49, %v575_v45  ;;  %v307_v49 = vld [vmem:[%s1530_s1 + $0xd0] sm:$0xff] }
 0x14e   : > { %v669_v44 = vadd.f32 %v505_v43, %v293_v24 }
 0x14f   : > { %v680_v52 = vadd.f32 %v635_v50, %v304_v46 }
 0x150   : > { %710 = vst [vmem:[%s1530_s1 + $0x60] sm:$0xff] %v669_v44 }
 0x151   : > { %721 = vst.msk [vmem:[%s1530_s1 + $0xb8] sm:$0xff] %vm698_vm1, %v680_v52 }
 0x152   : > { %v447_v51 = vpop.f32.mrf.mxu0 }
 0x153   : > { %v506_v54 = vpop.f32.mrf.mxu1  ;;  %v578_v47 = vpop.f32.mrf.mxu2 }
 0x154   : > { %v507_v55 = vadd.f32 %v506_v54, %v447_v51  ;;  %v637_v57 = vpop.f32.mrf.mxu3 }
 0x155   : > { %v638_v48 = vadd.f32 %v637_v57, %v578_v47 }
 0x156   : > { %v671_v56 = vadd.f32 %v507_v55, %v295_v53  ;;  %v318_v55 = vld [vmem:[%s1530_s1 + $0x128] sm:$0xff] }
 0x157   : > { %v682_v60 = vadd.f32 %v638_v48, %v306_v58  ;;  %v309_v58 = vld [vmem:[%s1530_s1 + $0xe0] sm:$0xff] }
 0x158   : > { %712 = vst [vmem:[%s1530_s1 + $0x70] sm:$0xff] %v671_v56 }
 0x159   : > { %723 = vst.msk [vmem:[%s1530_s1 + $0xc8] sm:$0xff] %vm698_vm1, %v682_v60 }
 0x15a   : > { %v450_v59 = vpop.f32.mrf.mxu0 }
 0x15b   : > { %v509_v62 = vpop.f32.mrf.mxu1  ;;  %v580_v1 = vpop.f32.mrf.mxu2 }
 0x15c   : > { %v510_v63 = vadd.f32 %v509_v62, %v450_v59  ;;  %v639_v3 = vpop.f32.mrf.mxu3  ;;  %v320_v62 = vld [vmem:[%s1530_s1 + $0x138] sm:$0xff] }
 0x15d   : > { %v640_v4 = vadd.f32 %v639_v3, %v580_v1  ;;  %v311_v3 = vld [vmem:[%s1530_s1 + $0xf0] sm:$0xff] }
 0x15e   : > { %v673_v0 = vadd.f32 %v510_v63, %v297_v61 }
 0x15f   : > { %v684_v6 = vadd.f32 %v640_v4, %v308_v2 }
 0x160   : > { %714 = vst [vmem:[%s1530_s1 + $0x80] sm:$0xff] %v673_v0 }
 0x161   : > { %725 = vst.msk [vmem:[%s1530_s1 + $0xd8] sm:$0xff] %vm698_vm1, %v684_v6 }
 0x162   : > { %v452_v5 = vpop.f32.mrf.mxu0 }
 0x163   : > { %v511_v8 = vpop.f32.mrf.mxu1  ;;  %v583_v37 = vpop.f32.mrf.mxu2 }
 0x164   : > { %v512_v9 = vadd.f32 %v511_v8, %v452_v5  ;;  %v642_v11 = vpop.f32.mrf.mxu3  ;;  %v313_v8 = vld [vmem:[%s1530_s1 + $0x100] sm:$0xff] }
 0x165   : > { %v643_v38 = vadd.f32 %v642_v11, %v583_v37 }
 0x166   : > { %v675_v10 = vadd.f32 %v512_v9, %v299_v7 }
 0x167   : > { %v686_v14 = vadd.f32 %v643_v38, %v310_v12  ;;  %v315_v12 = vld [vmem:[%s1530_s1 + $0x110] sm:$0xff] }
 0x168   : > { %716 = vst [vmem:[%s1530_s1 + $0x90] sm:$0xff] %v675_v10 }
 0x169   : > { %727 = vst.msk [vmem:[%s1530_s1 + $0xe8] sm:$0xff] %vm698_vm1, %v686_v14 }
 0x16a   : > { %v455_v13 = vpop.f32.mrf.mxu0 }
 0x16b   : > { %v514_v16 = vpop.f32.mrf.mxu1  ;;  %v585_v19 = vpop.f32.mrf.mxu2 }
 0x16c   : > { %v515_v17 = vadd.f32 %v514_v16, %v455_v13  ;;  %v644_v21 = vpop.f32.mrf.mxu3  ;;  %v317_v16 = vld [vmem:[%s1530_s1 + $0x120] sm:$0xff] }
 0x16d   : > { %v645_v22 = vadd.f32 %v644_v21, %v585_v19  ;;  %v319_v21 = vld [vmem:[%s1530_s1 + $0x130] sm:$0xff] }
 0x16e   : > { %v677_v18 = vadd.f32 %v515_v17, %v301_v15 }
 0x16f   : > { %v688_v25 = vadd.f32 %v645_v22, %v312_v20 }
 0x170   : > { %718 = vst [vmem:[%s1530_s1 + $0xa0] sm:$0xff] %v677_v18 }
 0x171   : > { %729 = vst.msk [vmem:[%s1530_s1 + $0xf8] sm:$0xff] %vm698_vm1, %v688_v25 }
 0x172   : > { %v457_v23 = vpop.f32.mrf.mxu0 }
 0x173   : > { %v516_v28 = vpop.f32.mrf.mxu1  ;;  %v588_v31 = vpop.f32.mrf.mxu2 }
 0x174   : > { %v517_v29 = vadd.f32 %v516_v28, %v457_v23  ;;  %v647_v32 = vpop.f32.mrf.mxu3 }
 0x175   : > { %v648_v34 = vadd.f32 %v647_v32, %v588_v31 }
 0x176   : > { %v679_v30 = vadd.f32 %v517_v29, %v303_v27 }
 0x177   : > { %v690_v36 = vadd.f32 %v648_v34, %v314_v33 }
 0x178   : > { %720 = vst [vmem:[%s1530_s1 + $0xb0] sm:$0xff] %v679_v30 }
 0x179   : > { %731 = vst.msk [vmem:[%s1530_s1 + $0x108] sm:$0xff] %vm698_vm1, %v690_v36 }
 0x17a   : > { %v460_v35 = vpop.f32.mrf.mxu0 }
 0x17b   : > { %v519_v40 = vpop.f32.mrf.mxu1  ;;  %v590_v24 = vpop.f32.mrf.mxu2 }
 0x17c   : > { %v520_v41 = vadd.f32 %v519_v40, %v460_v35  ;;  %v649_v43 = vpop.f32.mrf.mxu3 }
 0x17d   : > { %v650_v44 = vadd.f32 %v649_v43, %v590_v24 }
 0x17e   : > { %v681_v42 = vadd.f32 %v520_v41, %v305_v39 }
 0x17f   : > { %v692_v46 = vadd.f32 %v650_v44, %v316_v26 }
 0x180   : > { %722 = vst [vmem:[%s1530_s1 + $0xc0] sm:$0xff] %v681_v42 }
 0x181   : > { %733 = vst.msk [vmem:[%s1530_s1 + $0x118] sm:$0xff] %vm698_vm1, %v692_v46 }
 0x182   : > { %v462_v45 = vpop.f32.mrf.mxu0 }
 0x183   : > { %v521_v50 = vpop.f32.mrf.mxu1  ;;  %v593_v53 = vpop.f32.mrf.mxu2 }
 0x184   : > { %v522_v51 = vadd.f32 %v521_v50, %v462_v45  ;;  %v652_v54 = vpop.f32.mrf.mxu3 }
 0x185   : > { %v653_v56 = vadd.f32 %v652_v54, %v593_v53 }
 0x186   : > { %v683_v52 = vadd.f32 %v522_v51, %v307_v49 }
 0x187   : > { %v694_v57 = vadd.f32 %v653_v56, %v318_v55 }
 0x188   : > { %724 = vst [vmem:[%s1530_s1 + $0xd0] sm:$0xff] %v683_v52 }
 0x189   : > { %735 = vst.msk [vmem:[%s1530_s1 + $0x128] sm:$0xff] %vm698_vm1, %v694_v57 }
 0x18a   : > { %v465_v47 = vpop.f32.mrf.mxu0 }
 0x18b   : > { %v524_v48 = vpop.f32.mrf.mxu1  ;;  %v595_v61 = vpop.f32.mrf.mxu2 }
 0x18c   : > { %v525_v59 = vadd.f32 %v524_v48, %v465_v47  ;;  %v654_v63 = vpop.f32.mrf.mxu3 }
 0x18d   : > { %v655_v0 = vadd.f32 %v654_v63, %v595_v61 }
 0x18e   : > { %v685_v60 = vadd.f32 %v525_v59, %v309_v58 }
 0x18f   : > { %v696_v2 = vadd.f32 %v655_v0, %v320_v62 }
 0x190   : > { %726 = vst [vmem:[%s1530_s1 + $0xe0] sm:$0xff] %v685_v60 }
 0x191   : > { %737 = vst.msk [vmem:[%s1530_s1 + $0x138] sm:$0xff] %vm698_vm1, %v696_v2 }
 0x192   : > { %v467_v1 = vpop.f32.mrf.mxu0 }
 0x193   : > { %v526_v4 = vpop.f32.mrf.mxu1 }
 0x194   : > { %v527_v5 = vadd.f32 %v526_v4, %v467_v1 }
 0x196   : > { %v687_v6 = vadd.f32 %v527_v5, %v311_v3 }
 0x198   : > { %728 = vst [vmem:[%s1530_s1 + $0xf0] sm:$0xff] %v687_v6 }
 0x19a   : > { %v470_v7 = vpop.f32.mrf.mxu0 }
 0x19b   : > { %v529_v9 = vpop.f32.mrf.mxu1 }
 0x19c   : > { %v530_v10 = vadd.f32 %v529_v9, %v470_v7 }
 0x19e   : > { %v689_v37 = vadd.f32 %v530_v10, %v313_v8 }
 0x1a0   : > { %730 = vst [vmem:[%s1530_s1 + $0x100] sm:$0xff] %v689_v37 }
 0x1a2   : > { %v472_v11 = vpop.f32.mrf.mxu0 }
 0x1a3   : > { %v531_v38 = vpop.f32.mrf.mxu1 }
 0x1a4   : > { %v532_v13 = vadd.f32 %v531_v38, %v472_v11 }
 0x1a6   : > { %v691_v14 = vadd.f32 %v532_v13, %v315_v12 }
 0x1a8   : > { %732 = vst [vmem:[%s1530_s1 + $0x110] sm:$0xff] %v691_v14 }
 0x1aa   : > { %v475_v15 = vpop.f32.mrf.mxu0 }
 0x1ab   : > { %v534_v17 = vpop.f32.mrf.mxu1 }
 0x1ac   : > { %v535_v18 = vadd.f32 %v534_v17, %v475_v15 }
 0x1ae   : > { %v693_v19 = vadd.f32 %v535_v18, %v317_v16 }
 0x1b0   : > { %734 = vst [vmem:[%s1530_s1 + $0x120] sm:$0xff] %v693_v19 }
 0x1b2   : > { %v477_v20 = vpop.f32.mrf.mxu0 }
 0x1b3   : > { %v536_v22 = vpop.f32.mrf.mxu1 }
 0x1b4   : > { %v537_v23 = vadd.f32 %v536_v22, %v477_v20 }
 0x1b6   : > { %v695_v25 = vadd.f32 %v537_v23, %v319_v21 }
 0x1b8   : > { %736 = vst [vmem:[%s1530_s1 + $0x130] sm:$0xff] %v695_v25 }
 0x1b9 PF: > { %p8_p9 = scmp.ge.s32.totalorder %s961_s10, 4   ;;  %s1531_s6 = smov %s927_s7 }
 0x1ba   : > { %s1532_s7 = smov %s970_s13  ;;  %s1533_s8 = smov %s961_s10 }
 0x1bb   :  { %10 = sbr.rel (!%p8_p9) target bundleno = 2 (0x2), region = 97 }

// kernel: dcu_net_decoder_forward.3
= control target key start
LH: loop header
LB: loop body
LE: loop exit
PB: predicated region body
PF: predicated region fallthrough
CT: control target
= control target key end

     0   :  { %s691_s9 = smov 0   ;;  %s693_s10 = smov 0   ;;  %s836_s0 = inlined_call_operand.vmem [shape: bf16[8,160], index: 0, kind: input, shape index: {}]   ;;  %s837_s1 = inlined_call_operand.vmem [shape: bf16[160,512], index: 1, kind: input, shape index: {}]   ;;  %s838_s2 = inlined_call_operand.vmem [shape: f32[8,512], index: 2, kind: output, shape index: {}]  }
   0x1   :  { %s695_s11 = smov 0  }
   0x2 LB: > { %s512_s12 = sadd.s32 4294967295, %s674_s11   ;;  %s708_s13 = sadd.s32 1, %s674_s11   ;;  %s674_s11 = sphi %s695_s11, %s841_s11   ;;  %s670_s10 = sphi %s693_s10, %s840_s10   ;;  %s666_s9 = sphi %s691_s9, %s839_s9  }
   0x3   : > { %s37_s14 = ssub.s32 %s674_s11, %s708_s13  ;;  %s40_s15 = sadd.s32 1, %s670_s10 }
   0x4   : > { %p38_p0 = scmp.eq.s32.totalorder %s37_s14, 0  ;;  %p47_p1 = scmp.ne.s32.totalorder %s670_s10, %s666_s9 }
   0x5   : > { %p48_p2 = scmp.eq.s32.totalorder %s674_s11, 0  ;;  %p515_p4 = scmp.ge.s32.totalorder %s674_s11, 2 }
   0x6   : > { %s717_s16 = scalar_select %p38_p0, %s670_s10, %s40_s15  }
   0x7   : > { %p49_p3 = por %p48_p2, %p47_p1  ;;  %102 = sbr.rel (%p515_p4) target bundleno = 36 (0x24), region = 20 }
   0xc   : > { %105 = sbr.rel (!%p49_p3) target bundleno = 36 (0x24), region = 24  ;;  %s107_s17 = sand.u32 (%p49_p3), 1, %s670_s10  }
   0xd   : > { %s605_s18 = sshll.u32 (%p49_p3), %s674_s11, 3  ;;  %s626_s19 = smul.u32 (%p49_p3), 160, %s107_s17 }
   0xe   : > { %s725_s22 = scalar_lea.vmem (%p49_p3), %s837_s1, %s605_s18 }
   0xf   : > { %v179_v0 = vld [vmem:[%s725_s22] sm:$0xff] (%p49_p3)  ;;  %v181_v1 = vld [vmem:[%s725_s22 + $0x10] sm:$0xff] (%p49_p3)  ;;  %s730_s23 = scalar_lea.vmem (%p49_p3), [#allocation2], %s626_s19 }
  0x10   : > { %v183_v2 = vld [vmem:[%s725_s22 + $0x20] sm:$0xff] (%p49_p3)  ;;  %180 = vst [vmem:[%s730_s23] sm:$0xff] (%p49_p3), %v179_v0  ;;  %v185_v3 = vld [vmem:[%s725_s22 + $0x30] sm:$0xff] (%p49_p3) }
  0x11   : > { %182 = vst [vmem:[%s730_s23 + $0x8] sm:$0xff] %v181_v1  ;;  %v187_v4 = vld [vmem:[%s725_s22 + $0x40] sm:$0xff]  ;;  %v189_v5 = vld [vmem:[%s725_s22 + $0x50] sm:$0xff] }
  0x12   : > { %184 = vst [vmem:[%s730_s23 + $0x10] sm:$0xff] %v183_v2  ;;  %v191_v6 = vld [vmem:[%s725_s22 + $0x60] sm:$0xff]  ;;  %v193_v7 = vld [vmem:[%s725_s22 + $0x70] sm:$0xff] }
  0x13   : > { %186 = vst [vmem:[%s730_s23 + $0x18] sm:$0xff] %v185_v3  ;;  %v195_v8 = vld [vmem:[%s725_s22 + $0x80] sm:$0xff]  ;;  %v197_v9 = vld [vmem:[%s725_s22 + $0x90] sm:$0xff] }
  0x14   : > { %188 = vst [vmem:[%s730_s23 + $0x20] sm:$0xff] %v187_v4  ;;  %v199_v10 = vld [vmem:[%s725_s22 + $0xa0] sm:$0xff]  ;;  %v201_v11 = vld [vmem:[%s725_s22 + $0xb0] sm:$0xff] }
  0x15   : > { %190 = vst [vmem:[%s730_s23 + $0x28] sm:$0xff] %v189_v5  ;;  %v203_v12 = vld [vmem:[%s725_s22 + $0xc0] sm:$0xff]  ;;  %v205_v13 = vld [vmem:[%s725_s22 + $0xd0] sm:$0xff] }
  0x16   : > { %192 = vst [vmem:[%s730_s23 + $0x30] sm:$0xff] %v191_v6  ;;  %v207_v14 = vld [vmem:[%s725_s22 + $0xe0] sm:$0xff]  ;;  %v209_v15 = vld [vmem:[%s725_s22 + $0xf0] sm:$0xff] }
  0x17   : > { %194 = vst [vmem:[%s730_s23 + $0x38] sm:$0xff] %v193_v7  ;;  %v211_v16 = vld [vmem:[%s725_s22 + $0x100] sm:$0xff]  ;;  %v213_v17 = vld [vmem:[%s725_s22 + $0x110] sm:$0xff] }
  0x18   : > { %196 = vst [vmem:[%s730_s23 + $0x40] sm:$0xff] %v195_v8  ;;  %v215_v18 = vld [vmem:[%s725_s22 + $0x120] sm:$0xff]  ;;  %v217_v19 = vld [vmem:[%s725_s22 + $0x130] sm:$0xff] }
  0x19   : > { %198 = vst [vmem:[%s730_s23 + $0x48] sm:$0xff] %v197_v9 }
  0x1a   : > { %200 = vst [vmem:[%s730_s23 + $0x50] sm:$0xff] %v199_v10 }
  0x1b   : > { %202 = vst [vmem:[%s730_s23 + $0x58] sm:$0xff] %v201_v11 }
  0x1c   : > { %204 = vst [vmem:[%s730_s23 + $0x60] sm:$0xff] %v203_v12 }
  0x1d   : > { %206 = vst [vmem:[%s730_s23 + $0x68] sm:$0xff] %v205_v13 }
  0x1e   : > { %208 = vst [vmem:[%s730_s23 + $0x70] sm:$0xff] %v207_v14 }
  0x1f   : > { %210 = vst [vmem:[%s730_s23 + $0x78] sm:$0xff] %v209_v15 }
  0x20   : > { %212 = vst [vmem:[%s730_s23 + $0x80] sm:$0xff] %v211_v16 }
  0x21   : > { %214 = vst [vmem:[%s730_s23 + $0x88] sm:$0xff] %v213_v17 }
  0x22   : > { %216 = vst [vmem:[%s730_s23 + $0x90] sm:$0xff] %v215_v18 }
  0x23   : > { %218 = vst [vmem:[%s730_s23 + $0x98] sm:$0xff] %v217_v19 }
  0x24 PF: > { %p518_p5 = scmp.ge.s32.totalorder %s674_s11, 1  ;;  %p223_p6 = scmp.lt.s32.totalorder %s674_s11, 3 }
  0x26   : > { %p224_p7 = pnand %p518_p5, %p223_p6 }
  0x27   : > { %s230_s24 = sand.u32 (!%p224_p7), 1, %s666_s9   ;;  %s519_s29 = sshll.u32 (!%p224_p7), %s512_s12, 1 }
  0x28   : > { %227 = sbr.rel (%p224_p7) target bundleno = 220 (0xdc), region = 62  ;;  %p253_p8 = scmp.lt.s32.totalorder (!%p224_p7), %s519_s29, 3 }
  0x29   : > { %s627_s25 = smul.u32 (!%p224_p7), 160, %s230_s24 }
  0x2b   : > { %s772_s26 = scalar_lea.vmem (!%p224_p7), [#allocation2], %s627_s25 }
  0x2d   : > { %v579_v20 = vld [vmem:[%s772_s26 + $0x70] sm:$0xf]  ;;  %v621_v21 = vld [vmem:[%s772_s26 + $0x74] sm:$0xf0]  ;;  %v620_v22 = vld [vmem:[%s772_s26 + $0x74] sm:$0xf] }
  0x2e   : > { %v580_v23 = vor.u32 %v621_v21, %v579_v20  ;;  %v581_v24 = vld [vmem:[%s772_s26 + $0x78] sm:$0xf0]  ;;  %v571_v25 = vld [vmem:[%s772_s26 + $0x60] sm:$0xf]  ;;  %v619_v26 = vld [vmem:[%s772_s26 + $0x64] sm:$0xf0] }
  0x2f   : > { %v584_v27 = vor.u32 %v620_v22, %v581_v24  ;;  %v618_v28 = vld [vmem:[%s772_s26 + $0x64] sm:$0xf]  ;;  %v573_v29 = vld [vmem:[%s772_s26 + $0x68] sm:$0xf0]  ;;  %v572_v30 = vor.u32 %v619_v26, %v571_v25  ;;  %v563_v32 = vld [vmem:[%s772_s26 + $0x50] sm:$0xf] }
  0x30   : > { %390 = vmatpush.bf16.msra.mxu0 %v580_v23  ;;  %v576_v31 = vor.u32 %v618_v28, %v573_v29  ;;  %v617_v33 = vld [vmem:[%s772_s26 + $0x54] sm:$0xf0]  ;;  %v616_v34 = vld [vmem:[%s772_s26 + $0x54] sm:$0xf]  ;;  %v565_v35 = vld [vmem:[%s772_s26 + $0x58] sm:$0xf0] }
  0x31   : > { %416 = vmatpush.bf16.msra.mxu2 %v584_v27  ;;  %v624_v36 = vld [vmem:[%s772_s26 + $0x94] sm:$0xf]  ;;  %v790_v37 = vld [vmem:[%s836_s0] sm:$0xff]  ;;  %v564_v38 = vor.u32 %v617_v33, %v563_v32  ;;  %v615_v40 = vld [vmem:[%s772_s26 + $0x44] sm:$0xf0]  ;;  %v568_v42 = vor.u32 %v616_v34, %v565_v35  ;;  %vm386_vm0 = vcmask 261120  }
  0x32   : > { %v555_v39 = vld [vmem:[%s772_s26 + $0x40] sm:$0xf]  ;;  %v597_v41 = vld [vmem:[%s772_s26 + $0x98] sm:$0xf0]  ;;  %v614_v43 = vld [vmem:[%s772_s26 + $0x44] sm:$0xf]  ;;  %v282_v50 = vunpack.c.h.b16 %v790_v37  ;;  %v281_v17 = vunpack.c.l.b16 %v790_v37 }
  0x33   : > { %v557_v44 = vld [vmem:[%s772_s26 + $0x48] sm:$0xf0]  ;;  %v600_v45 = vor.u32 %v624_v36, %v597_v41  ;;  %v622_v46 = vld [vmem:[%s772_s26 + $0x84] sm:$0xf]  ;;  %v595_v48 = vld [vmem:[%s772_s26 + $0x90] sm:$0xf]  ;;  %v556_v53 = vor.u32 %v615_v40, %v555_v39 }
  0x34   : > { %391 = vmatpush.bf16.msra.mxu0 %v572_v30  ;;  %v589_v47 = vld [vmem:[%s772_s26 + $0x88] sm:$0xf0]  ;;  %v625_v49 = vld [vmem:[%s772_s26 + $0x94] sm:$0xf0]  ;;  %v587_v54 = vld [vmem:[%s772_s26 + $0x80] sm:$0xf]  ;;  %v560_v56 = vor.u32 %v614_v43, %v557_v44  ;;  %v284_v62 = vpack.c.b16 %v282_v50, %v282_v50  ;;  %v283_v20 = vpack.c.b16 %v281_v17, %v281_v17 }
  0x35   : > { %417 = vmatpush.bf16.msra.mxu2 %v576_v31  ;;  %435 = vmatpush.bf16.msra.mxu3 %v600_v45  ;;  %v592_v51 = vor.u32 %v622_v46, %v589_v47  ;;  %v596_v52 = vor.u32 %v625_v49, %v595_v48  ;;  %v623_v55 = vld [vmem:[%s772_s26 + $0x84] sm:$0xf0]  ;;  %v547_v57 = vld [vmem:[%s772_s26 + $0x30] sm:$0xf]  ;;  %v613_v58 = vld [vmem:[%s772_s26 + $0x34] sm:$0xf0] }
  0x36   : > { %v588_v59 = vor.u32 %v623_v55, %v587_v54  ;;  %v612_v60 = vld [vmem:[%s772_s26 + $0x34] sm:$0xf]  ;;  %v549_v61 = vld [vmem:[%s772_s26 + $0x38] sm:$0xf0]  ;;  %v548_v63 = vor.u32 %v613_v58, %v547_v57  ;;  %v539_v1 = vld [vmem:[%s772_s26 + $0x20] sm:$0xf] }
  0x37   : > { %409 = vmatpush.bf16.msra.mxu1 %v596_v52  ;;  %v552_v0 = vor.u32 %v612_v60, %v549_v61  ;;  %v611_v2 = vld [vmem:[%s772_s26 + $0x24] sm:$0xf0]  ;;  %v610_v3 = vld [vmem:[%s772_s26 + $0x24] sm:$0xf]  ;;  %v541_v4 = vld [vmem:[%s772_s26 + $0x28] sm:$0xf0] }
  0x38   : > { %392 = vmatpush.bf16.msra.mxu0 %v564_v38  ;;  %v540_v5 = vor.u32 %v611_v2, %v539_v1  ;;  %v544_v6 = vor.u32 %v610_v3, %v541_v4  ;;  %v531_v7 = vld [vmem:[%s772_s26 + $0x10] sm:$0xf]  ;;  %v609_v8 = vld [vmem:[%s772_s26 + $0x14] sm:$0xf0]  ;;  %v608_v9 = vld [vmem:[%s772_s26 + $0x14] sm:$0xf] }
  0x39   : > { %418 = vmatpush.bf16.msra.mxu2 %v568_v42  ;;  %436 = vmatpush.bf16.msra.mxu3 %v592_v51  ;;  %v533_v10 = vld [vmem:[%s772_s26 + $0x18] sm:$0xf0]  ;;  %v532_v11 = vor.u32 %v609_v8, %v531_v7  ;;  %v523_v13 = vld [vmem:[%s772_s26] sm:$0xf]  ;;  %v607_v14 = vld [vmem:[%s772_s26 + $0x4] sm:$0xf0] }
  0x3a   : > { %v536_v12 = vor.u32 %v608_v9, %v533_v10  ;;  %v606_v15 = vld [vmem:[%s772_s26 + $0x4] sm:$0xf]  ;;  %v525_v16 = vld [vmem:[%s772_s26 + $0x8] sm:$0xf0]  ;;  %v524_v18 = vor.u32 %v607_v14, %v523_v13  ;;  %s843_s29 = smov (!%p253_p8, %s519_s29), 3 }
  0x3b   : > { %410 = vmatpush.bf16.msra.mxu1 %v588_v59  ;;  %v528_v19 = vor.u32 %v606_v15, %v525_v16  ;;  %s520_s30 = sshll.u32 %s843_s29, 3 }
  0x3c   : > { %393 = vmatpush.bf16.msra.mxu0 %v556_v53  ;;  %602 = vmatmul.msk.bf16.vlgmr.msra.gmra.mxu3 %vm386_vm0, %v284_v62  ;;  %s256_s5 = scalar_lea.vmem %s838_s2, %s520_s30 }
  0x3d   : > { %419 = vmatpush.bf16.msra.mxu2 %v560_v56 }
  0x3e   : > { %601 = vmatmul.msk.bf16.vlgmr.msra.gmra.mxu1 %vm386_vm0, %v284_v62 }
  0x40   : > { %394 = vmatpush.bf16.msra.mxu0 %v548_v63 }
  0x41   : > { %420 = vmatpush.bf16.msra.mxu2 %v552_v0 }
  0x44   : > { %395 = vmatpush.bf16.msra.mxu0 %v540_v5 }
  0x45   : > { %421 = vmatpush.bf16.msra.mxu2 %v544_v6 }
  0x48   : > { %396 = vmatpush.bf16.msra.mxu0 %v532_v11 }
  0x49   : > { %422 = vmatpush.bf16.msra.mxu2 %v536_v12 }
  0x4c   : > { %397 = vmatpush.bf16.msra.mxu0 %v524_v18 }
  0x4d   : > { %423 = vmatpush.bf16.msra.mxu2 %v528_v19 }
  0x4f   : > { %398 = vmatmul.bf16.vlgmr.msra.gmra.mxu0 %v283_v20 }
  0x50   : > { %424 = vmatmul.bf16.vlgmr.msra.gmra.mxu2 %v283_v20 }
  0xbb   : > { %v412_v21 = vpop.f32.mrf.mxu1 }
  0xbf   : > { %v438_v22 = vpop.f32.mrf.mxu3 }
  0xc3   : > { %v414_v23 = vpop.f32.mrf.mxu1 }
  0xc7   : > { %v440_v24 = vpop.f32.mrf.mxu3 }
  0xcc   : > { %v399_v25 = vpop.f32.mrf.mxu0 }
  0xcd   : > { %v413_v26 = vadd.f32 %v412_v21, %v399_v25 }
  0xcf   : > { %vm442_vm1 = vcmp.ge.f32.partialorder %v413_v26, 0.0  ;;  %v444_v27 = vmul.f32 0.1, %v413_v26 }
  0xd1   : > { %v446_v28 = vsel %vm442_vm1, %v413_v26, %v444_v27 }
  0xd2   : > { %448 = vst [vmem:[%s256_s5] sm:$0xff] %v446_v28 }
  0xd3   : > { %v425_v29 = vpop.f32.mrf.mxu2 }
  0xd4   : > { %v439_v30 = vadd.f32 %v438_v22, %v425_v29  ;;  %v401_v31 = vpop.f32.mrf.mxu0 }
  0xd6   : > { %vm443_vm2 = vcmp.ge.f32.partialorder %v439_v30, 0.0  ;;  %v445_v32 = vmul.f32 0.1, %v439_v30 }
  0xd8   : > { %v447_v33 = vsel %vm443_vm2, %v439_v30, %v445_v32 }
  0xd9   : > { %449 = vst [vmem:[%s256_s5 + $0x8] sm:$0xff] %v447_v33 }
  0xdb   : > { %v427_v34 = vpop.f32.mrf.mxu2 }
  0xdc PF: > { %p9_p9 = scmp.ge.s32.totalorder %s708_s13, 4   ;;  %s839_s9 = smov %s670_s10 }
  0xdd   : > { %s840_s10 = smov %s717_s16  ;;  %s841_s11 = smov %s708_s13 }
  0xde   :  { %11 = sbr.rel (!%p9_p9) target bundleno = 2 (0x2), region = 101 }

</bundles_post_ra>
